<compile_context>
chip_gen: v7x
topology: tpu7x:2x2x1
jax: 0.10.0
libtpu: 0.0.40
codegen_flags: <defaults>
</compile_context>

<pallas_src>
import math

import jax
import jax.numpy as jnp
from jax.experimental import pallas as pl
from jax.experimental.pallas import tpu as pltpu


def _init_positional_encoding(d_model: int, max_len: int, padding_idx) -> jnp.ndarray:
    """Deterministic sinusoidal table, identical to the PyTorch __init__."""
    position = jnp.arange(max_len, dtype=jnp.float32)[:, None]            # (max_len, 1)
    div_term = jnp.exp(
        jnp.arange(0, d_model, 2, dtype=jnp.float32) * (-math.log(10000.0) / d_model)
    )                                                                     # (d_model/2,)
    angles = position * div_term                                          # (max_len, d_model/2)
    pe = jnp.zeros((max_len, d_model), dtype=jnp.float32)
    pe = pe.at[:, 0::2].set(jnp.sin(angles))
    pe = pe.at[:, 1::2].set(jnp.cos(angles))
    if padding_idx is not None:
        pe = pe.at[padding_idx, :].set(0.0)
    return pe


def _pos_enc_kernel(x_ref, pe_ref, o_ref, *, padding_idx):
    # x_ref:  (B, T)  lane-dense tile of the flattened input
    # pe_ref: (1, T)  matching slice of the flattened positional table
    x = x_ref[...]
    pe = pe_ref[...]
    y = x + pe  # sublane broadcast over the batch axis (pure VPU work)
    if padding_idx is not None:
        y = jnp.where(x == jnp.asarray(padding_idx, dtype=x.dtype), x, y)
    o_ref[...] = y.astype(o_ref.dtype)
    # Dropout: eval mode -> identity (no-op).


def positional_encoding_forward(
    x, pos_embed, padding_idx=0, *, target_block_bytes=4 * 1024 * 1024
):
    """x: (B, S, D); pos_embed: (max_len, D). Returns (B, S, D)."""
    B, S, D = x.shape
    itemsize = jnp.dtype(x.dtype).itemsize
    flat = S * D

    # Lane-dense layout: flatten (S, D) -> S*D. x[b, s, d] and pe[s, d] share
    # the same flat index s*D + d, so any column chunk of x2d lines up
    # elementwise with the same chunk of pe2d.
    x2d = x.reshape(B, flat)
    pe2d = pos_embed[:S, :].reshape(1, flat).astype(x.dtype)

    # Tile the flattened axis. Target ~4 MiB per x block; T is a multiple of
    # 128 lanes unless the whole flattened axis already fits in one block.
    t = max(128, ((target_block_bytes // (B * itemsize)) // 128) * 128)
    T = flat if flat <= t else t
    grid = (pl.cdiv(flat, T),)

    # VMEM budget: double-buffered input + output + PE blocks, with headroom.
    x_block_bytes = B * T * itemsize
    pe_block_bytes = T * itemsize
    vmem_need = 2 * x_block_bytes + 2 * x_block_bytes + 2 * pe_block_bytes
    vmem_limit = min(max(2 * vmem_need, 16 * 1024 * 1024), 48 * 1024 * 1024)

    kernel = lambda x_ref, pe_ref, o_ref: _pos_enc_kernel(
        x_ref, pe_ref, o_ref, padding_idx=padding_idx
    )

    out2d = pl.pallas_call(
        kernel,
        out_shape=jax.ShapeDtypeStruct((B, flat), x.dtype),
        grid_spec=pl.GridSpec(
            grid=grid,
            in_specs=[
                pl.BlockSpec((B, T), lambda c: (0, c)),  # x tile (full batch per tile)
                pl.BlockSpec((1, T), lambda c: (0, c)),  # matching PE slice
            ],
            out_specs=pl.BlockSpec((B, T), lambda c: (0, c)),
        ),
        compiler_params=pltpu.CompilerParams(
            dimension_semantics=("parallel",),
            vmem_limit_bytes=vmem_limit,
        ),
        input_output_aliases={0: 0},  # output may reuse the x buffer
    )(x2d, pe2d)

    return out2d.reshape(B, S, D)


if __name__ == "__main__":
    d_model = 32
    max_len = 64
    padding_idx = 0
    batch, seq_len = 2, 8

    pos_embed = _init_positional_encoding(d_model, max_len, padding_idx)

    key = jax.random.PRNGKey(0)
    x = jax.random.normal(key, (batch, seq_len, d_model), dtype=jnp.float32)
    # Plant some exact padding values so the `where(x == padding_idx, ...)`
    # path is exercised.
    x = x.at[0, 0, :].set(float(padding_idx))
    x = x.at[1, 3, 5].set(float(padding_idx))

    # Reference (eval-mode dropout == identity) computed BEFORE the kernel
    # call, since the kernel declares an input/output alias on x.
    pe_slice = pos_embed[:seq_len, :]
    ref = jnp.where(x == float(padding_idx), x, x + pe_slice[None, :, :])
    ref = jax.block_until_ready(ref)

    out = positional_encoding_forward(x, pos_embed, padding_idx=padding_idx)
    out = jax.block_until_ready(out)

    assert jnp.allclose(out, ref, atol=1e-6), "mismatch vs reference"
    print("KERNEL_OK")
</pallas_src>

<mosaic_0001>
module attributes {stable_mosaic.version = 11 : i64} {
  func.func @_lambda_(%arg0: i32, %arg1: memref<2x256xf32, #tpu.memory_space<vmem>>, %arg2: memref<1x256xf32, #tpu.memory_space<vmem>>, %arg3: memref<2x256xf32, #tpu.memory_space<vmem>>) attributes {dimension_semantics = [#tpu.dimension_semantics<parallel>], iteration_bounds = array<i64: 1>, scalar_prefetch = 0 : i64, scratch_operands = 0 : i64, tpu.core_type = #tpu.core_type<tc>, window_params = [{transform_indices = @transform_0, window_bounds = array<i64: 2, 256>}, {transform_indices = @transform_1, window_bounds = array<i64: 1, 256>}, {transform_indices = @transform_2, window_bounds = array<i64: 2, 256>}]} {
    %c0 = arith.constant 0 : index
    %c0_0 = arith.constant 0 : index
    %0 = vector.load %arg1[%c0, %c0_0] : memref<2x256xf32, #tpu.memory_space<vmem>>, vector<2x256xf32>
    %c0_1 = arith.constant 0 : index
    %c0_2 = arith.constant 0 : index
    %1 = vector.load %arg2[%c0_1, %c0_2] : memref<1x256xf32, #tpu.memory_space<vmem>>, vector<1x256xf32>
    %2 = vector.broadcast %1 : vector<1x256xf32> to vector<2x256xf32>
    %3 = arith.addf %0, %2 : vector<2x256xf32>
    %cst = arith.constant 0.000000e+00 : f32
    %4 = vector.broadcast %cst : f32 to vector<2x256xf32>
    %5 = arith.cmpf oeq, %0, %4 : vector<2x256xf32>
    %6 = arith.select %5, %0, %3 : vector<2x256xi1>, vector<2x256xf32>
    %c0_3 = arith.constant 0 : index
    %c0_4 = arith.constant 0 : index
    %7 = vector.load %arg3[%c0_3, %c0_4] : memref<2x256xf32, #tpu.memory_space<vmem>>, vector<2x256xf32>
    tpu.vector_store %arg3[%c0_3, %c0_4], %6 {strides = array<i32>} : memref<2x256xf32, #tpu.memory_space<vmem>>, vector<2x256xf32>,
    return
  }
  func.func @transform_0(%arg0: i32) -> (i32, i32) {
    %c0_i32 = arith.constant 0 : i32
    %c0_i32_0 = arith.constant 0 : i32
    return %c0_i32, %arg0 : i32, i32
  }
  func.func @transform_1(%arg0: i32) -> (i32, i32) {
    %c0_i32 = arith.constant 0 : i32
    %c0_i32_0 = arith.constant 0 : i32
    return %c0_i32, %arg0 : i32, i32
  }
  func.func @transform_2(%arg0: i32) -> (i32, i32) {
    %c0_i32 = arith.constant 0 : i32
    %c0_i32_0 = arith.constant 0 : i32
    return %c0_i32, %arg0 : i32, i32
  }
}

</mosaic_0001>

<bundles_post_ra>
// kernel: tpu_custom_call.1
= control target key start
LH: loop header
LB: loop body
LE: loop exit
PB: predicated region body
PF: predicated region fallthrough
CT: control target
= control target key end

     0   :  { %7 = vsyncpa [#allocation3], 0  ;;  %s159_s0 = inlined_call_operand.hbm [shape: f32[2,256], index: 0, kind: input, shape index: {}, may-alias: {0,2}]   ;;  %s160_s1 = inlined_call_operand.vmem [shape: f32[1,256], index: 1, kind: input, shape index: {}]   ;;  %s161_s2 = inlined_call_operand.hbm [shape: f32[2,256], index: 2, kind: output, shape index: {}, may-alias: {0,2}]  }
   0x1   :  { %8 = vsyncpa [#allocation4], 0  ;;  %s114_s9 = smov [#allocation2]   ;;  %s66_s13 = scalar_lea.hbm %s159_s0, 64 }
   0x2   :  { %s15_s10 = sshll.u32 %s114_s9, 4  ;;  %p67_p0 = scmp.ne.s32.totalorder %s159_s0, %s66_s13  ;;  %s16_s10 = int_to_ptr.vmem [resolvable:$true] %s15_s10 }
   0x3   :  { %p70_p1 = scmp.lt.u32.totalorder %s66_s13, %s159_s0 }
   0x5   :  { %p72_p2 = pnand %p70_p1, %p67_p0 }
   0x7   :  { %75 = shalt.err (!%p72_p2)
}
   0x8   :  { %s76_s18 = scalar_lea.vmem %s16_s10, 64  ;;  %p81_p4 = scmp.lt.s32.totalorder %s16_s10, %s16_s10 }
   0x9   :  { %p77_p3 = scmp.ne.s32.totalorder %s16_s10, %s76_s18  ;;  %p82_p5 = scmp.lt.s32.totalorder %s76_s18, %s76_s18 }
   0xb   :  { %p83_p6 = por %p82_p5, %p81_p4 }
   0xd   :  { %p84_p7 = pnand %p83_p6, %p77_p3 }
   0xf   :  { %87 = shalt.err (!%p84_p7)
}
  0x10   :  { %18 = dma.hbm_to_vmem [thread:$0]  %s159_s0, 64, %s16_s10, [#allocation3]  }
  0x11   :  { %110 = dma.done.wait [#allocation3], 64  }
  0x12   :  { %111 = vsyncadd [#allocation3], 4294967232  ;;  %v27_v0 = vlaneseq  ;;  %v115_v1 = vmov 1983009808   ;;  %v25_v7 = vld [vmem:[%s160_s1] sm:$0x3] }
  0x13   :  { %v37_v2 = vunpack.c.l.s4 %v115_v1  ;;  %v24_v11 = vld [vmem:[#allocation2] sm:$0xf]  ;;  %s116_s0 = smov [#allocation5]  }
  0x14   :  { %v28_v3 = vshrl.u32 %v27_v0, 7  ;;  %s54_s23 = sshll.u32 %s116_s0, 4  ;;  %vm45_vm0 = vcmp.eq.f32.partialorder %v24_v11, 0.0  ;;  %s55_s23 = int_to_ptr.vmem [resolvable:$true] %s54_s23 }
  0x15   :  { %v38_v6 = vunpack.c.0.s8 %v37_v2  ;;  %s88_s24 = scalar_lea.vmem %s55_s23, 64  ;;  %p93_p9 = scmp.lt.s32.totalorder %s55_s23, %s55_s23 }
  0x16   :  { %v29_v4 = vsub.s32 0, %v28_v3  ;;  %v33_v5 = vsub.s32 1, %v28_v3  ;;  %p89_p8 = scmp.ne.s32.totalorder %s55_s23, %s88_s24  ;;  %p94_p10 = scmp.lt.s32.totalorder %s88_s24, %s88_s24 }
  0x17   :  { %v41_v10 = vsub.s32 %v38_v6, %v28_v3 }
  0x18   :  { %v30_v8 = vrot.slane %v25_v7, %v29_v4  ;;  %v34_v9 = vrot.slane %v25_v7, %v33_v5  ;;  %p95_p11 = por %p94_p10, %p93_p9 }
  0x1a   :  { %v35_v12 = vcombine.low %v30_v8, %v34_v9  ;;  %p96_p12 = pnand %p95_p11, %p89_p8 }
  0x1c   :  { %v42_v13 = vrot.slane %v35_v12, %v41_v10 }
  0x1e   :  { %v44_v14 = vadd.f32 %v42_v13, %v24_v11 }
  0x20   :  { %v46_v15 = vsel %vm45_vm0, %v24_v11, %v44_v14 }
  0x21   :  { %47 = vst [vmem:[#allocation5] sm:$0xf] %v46_v15 }
  0x22   :  { %99 = shalt.err (!%p96_p12)
}
  0x23   :  { %s100_s26 = scalar_lea.hbm %s161_s2, 64 }
  0x24   :  { %p101_p13 = scmp.ne.s32.totalorder %s161_s2, %s100_s26  ;;  %p104_p0 = scmp.lt.u32.totalorder %s100_s26, %s161_s2 }
  0x26   :  { %p106_p1 = pnand %p104_p0, %p101_p13 }
  0x28   :  { %109 = shalt.err (!%p106_p1)
}
  0x29   :  { %57 = dma.vmem_to_hbm [thread:$0]  %s55_s23, 64, %s161_s2, [#allocation4]  }
  0x2a   :  { %112 = dma.done.wait [#allocation4], 64  }
  0x2b   :  { %113 = vsyncadd [#allocation4], 4294967232 }
  0x2c   :  { %61 = vsyncpa [#allocation3], 1 }
  0x2d   :  { %62 = vsyncpa [#allocation4], 1 }

</bundles_post_ra>
